<compile_context>
chip_gen: v7x
topology: tpu7x:2x2x1
jax: 0.10.0
libtpu: 0.0.40
codegen_flags: <defaults>
</compile_context>

<pallas_src>
import math

import jax
import jax.numpy as jnp
from jax import lax
from jax.experimental import pallas as pl
from jax.experimental.pallas import tpu as pltpu

D_MODEL = 32
N_HEAD = 4
HEAD_DIM = D_MODEL // N_HEAD
N_ATOM = 3    # literal torch broadcasting requires N == 3
BATCH = 1     # ... and batch == 1

# Packed weight slab (D_MODEL + 1, FUSE_W):
#   rows 0..31 : [ Wq^T | Wk^T | Wvo | 0  ]   (in, out) layout
#   row  32    : [ bq   | bk   | bvo | bo ]
# Wvo[:, h] = Wv^T[:, h*hd:(h+1)*hd] @ wo_h   (value proj folded with o_proj, per head)
# bvo[h]    = bv_h . wo_h
FUSE_W = 2 * D_MODEL + N_HEAD + 1     # 69


def graph3d_kernel(r_ref, x_ref, w_ref, out_ref):
    N, D, NH, HD = N_ATOM, D_MODEL, N_HEAD, HEAD_DIM

    r = r_ref[...]                        # (N, 3)   [atom, coord]
    x = x_ref[...]                        # (N, D)   [atom, feature]
    W = w_ref[0:D, :]                     # (D, FUSE_W)
    b = w_ref[D:D + 1, :]                 # (1, FUSE_W)

    # ---- pairwise distances (torch.cdist) from per-coordinate (N, N) planes ----
    rT = r.T                              # (3, N): rT[c, j] = r[j, c]
    dx = rT[0:1, :] - r[:, 0:1]           # dx[i, j] = r[j, 0] - r[i, 0]
    dy = rT[1:2, :] - r[:, 1:2]
    dz = rT[2:3, :] - r[:, 2:3]
    r0 = jnp.sqrt(dx * dx + dy * dy + dz * dz)      # (N, N)
    bias = jnp.exp(-r0)
    inv_r = 1.0 / (r0 + 1e-6)             # literal torch broadcast divisor (kept exact)

    # ---- single fused MXU push: q | k | per-head v@wo ----
    proj = jnp.dot(x, W, preferred_element_type=jnp.float32) + b   # (N, FUSE_W)
    vwo_rows = proj[:, 2 * D:2 * D + NH].T        # (NH, N): row h = (v_h @ wo_h) per key
    bo = b[0:1, FUSE_W - 1:FUSE_W]                # (1, 1)

    inv_sqrt_hd = 1.0 / math.sqrt(HD)

    # ---- per-head logits: 4 independent tiny MXU pushes, issued back to back ----
    logits = []
    for h in range(NH):                   # static unroll
        q_h = proj[:, h * HD:(h + 1) * HD]             # (N, HD)
        k_h = proj[:, D + h * HD:D + (h + 1) * HD]     # (N, HD)
        s_h = lax.dot_general(q_h, k_h, (((1,), (1,)), ((), ())),
                              preferred_element_type=jnp.float32)   # (N, N)
        logits.append(s_h * inv_sqrt_hd + bias)

    # ---- softmax + head reduction (VPU / EUP only) ----
    # G[q, s] = sum_h softmax(logits_h)[q, s] * (v_h @ wo_h)[s]
    G = jnp.zeros((N, N), jnp.float32)
    for h in range(NH):
        lg = logits[h]
        m = jnp.max(lg, axis=-1, keepdims=True)
        e = jnp.exp(lg - m)
        aw = e / jnp.sum(e, axis=-1, keepdims=True)
        G = G + aw * vwo_rows[h:h + 1, :]

    Gn = G * inv_r                        # fold delta_pos's 1/(r0 + 1e-6)

    # force[q, p] = bo + sum_s (r[q, s] - r[p, s]) * Gn[q, s]
    #             = bo + rowsum(r * Gn)[q] - (Gn @ r^T)[q, p]
    t1 = jnp.sum(r * Gn, axis=-1, keepdims=True)                        # (N, 1)
    t2 = lax.dot_general(Gn, r, (((1,), (1,)), ((), ())),
                         preferred_element_type=jnp.float32)            # (N, N)
    out_ref[...] = t1 - t2 + bo


def pack_params(params):
    """One-time host-side packing of all weights/biases into a single slab."""
    wq, bq, wk, bk, wv, bv, wo, bo = params
    wo_vec = wo.reshape(D_MODEL)
    wv_t = wv.T                                                  # (in, out)
    wvo = (wv_t.reshape(D_MODEL, N_HEAD, HEAD_DIM)
           * wo_vec.reshape(1, N_HEAD, HEAD_DIM)).sum(axis=-1)   # (D, NH)
    bvo = (bv.reshape(N_HEAD, HEAD_DIM)
           * wo_vec.reshape(N_HEAD, HEAD_DIM)).sum(axis=-1)      # (NH,)
    w_rows = jnp.concatenate(
        [wq.T, wk.T, wvo, jnp.zeros((D_MODEL, 1), jnp.float32)], axis=1)   # (D, 69)
    b_row = jnp.concatenate([bq, bk, bvo, bo.reshape(1)]).reshape(1, FUSE_W)
    return jnp.concatenate([w_rows, b_row], axis=0).astype(jnp.float32)    # (33, 69)


def graph_3d_forward(r, x, w_packed):
    """r: (1, N, 3), x: (1, N, D), w_packed: (D+1, FUSE_W) -> force (1, N, 3, 1)."""
    assert r.shape == (BATCH, N_ATOM, 3) and x.shape == (BATCH, N_ATOM, D_MODEL)
    vmem = pl.BlockSpec(memory_space=pltpu.MemorySpace.VMEM)
    out = pl.pallas_call(
        graph3d_kernel,
        out_shape=jax.ShapeDtypeStruct((N_ATOM, 3), jnp.float32),
        in_specs=[vmem, vmem, vmem],
        out_specs=vmem,
    )(r[0], x[0], w_packed)
    # TODO(synk): if many graphs were available, add a batch grid axis with
    # dimension_semantics=("parallel",) to amortize launch/DMA cost (and use both
    # v7x TensorCores); the module's literal broadcasting pins batch == 1 here.
    return out.reshape(BATCH, N_ATOM, 3, 1)


def init_params(key):
    """Deterministic synthetic init matching torch.nn.Linear shapes."""
    ks = jax.random.split(key, 8)
    s = 1.0 / math.sqrt(D_MODEL)
    u = lambda k, shape: jax.random.uniform(k, shape, jnp.float32, -s, s)
    wq, bq = u(ks[0], (D_MODEL, D_MODEL)), u(ks[1], (D_MODEL,))
    wk, bk = u(ks[2], (D_MODEL, D_MODEL)), u(ks[3], (D_MODEL,))
    wv, bv = u(ks[4], (D_MODEL, D_MODEL)), u(ks[5], (D_MODEL,))
    wo, bo = u(ks[6], (1, D_MODEL)), u(ks[7], (1,))
    return (wq, bq, wk, bk, wv, bv, wo, bo)


def graph3d_reference(r, x, params):
    """Pure-jnp reference reproducing the torch module's literal semantics (bs=1, N=3)."""
    wq, bq, wk, bk, wv, bv, wo, bo = params
    r2, x2 = r[0], x[0]
    delta = r2[None, :, :] - r2[:, None, :]               # delta[i,j,c] = r[j,c]-r[i,c]
    r0 = jnp.sqrt(jnp.sum(delta * delta, axis=-1))        # (N, N)  == torch.cdist
    bias = jnp.exp(-r0)
    delta_pos = delta / (r0 + 1e-6)[None, :, :]           # literal (bs=1, N=3) broadcast
    q = x2 @ wq.T + bq
    k = x2 @ wk.T + bk
    v = x2 @ wv.T + bv
    out = jnp.zeros((N_ATOM, 3), jnp.float32)
    for h in range(N_HEAD):
        sl = slice(h * HEAD_DIM, (h + 1) * HEAD_DIM)
        logits = q[:, sl] @ k[:, sl].T / math.sqrt(HEAD_DIM) + bias
        aw = jax.nn.softmax(logits, axis=-1)
        for p in range(3):
            o_hp = (delta_pos[p] * aw) @ v[:, sl]         # (N, hd)
            out = out.at[:, p].add(o_hp @ wo[0, sl])
    out = out + bo[0]
    return out.reshape(BATCH, N_ATOM, 3, 1)


if __name__ == "__main__":
    key = jax.random.PRNGKey(0)
    k_r, k_x, k_p = jax.random.split(key, 3)

    r_in = jax.random.normal(k_r, (BATCH, N_ATOM, 3), jnp.float32)
    x_in = jax.random.normal(k_x, (BATCH, N_ATOM, D_MODEL), jnp.float32)
    params = init_params(k_p)
    w_packed = pack_params(params)        # packed once, outside the forward pass

    # TODO(synk): mask=None path only; the masked_fill branch is not exercised.
    force = graph_3d_forward(r_in, x_in, w_packed)
    jax.block_until_ready(force)
    assert force.shape == (BATCH, N_ATOM, 3, 1)

    # sanity check against the literal-semantics reference (scale-normalized max error)
    ref = graph3d_reference(r_in, x_in, params)
    scale = jnp.max(jnp.abs(ref)) + 1e-30
    rel_err = float(jnp.max(jnp.abs(force - ref)) / scale)
    assert rel_err < 2e-3, f"kernel/reference mismatch, rel_err={rel_err}"

    print("KERNEL_OK")
</pallas_src>

<mosaic_0001>
module attributes {stable_mosaic.version = 11 : i64} {
  func.func @graph3d_kernel(%arg0: memref<3x3xf32, #tpu.memory_space<vmem>>, %arg1: memref<3x32xf32, #tpu.memory_space<vmem>>, %arg2: memref<33x69xf32, #tpu.memory_space<vmem>>, %arg3: memref<3x3xf32, #tpu.memory_space<vmem>>) attributes {dimension_semantics = [], scalar_prefetch = 0 : i64, scratch_operands = 0 : i64, tpu.core_type = #tpu.core_type<tc>} {
    %c0 = arith.constant 0 : index
    %c0_0 = arith.constant 0 : index
    %0 = vector.load %arg0[%c0, %c0_0] : memref<3x3xf32, #tpu.memory_space<vmem>>, vector<3x3xf32>
    %c0_1 = arith.constant 0 : index
    %c0_2 = arith.constant 0 : index
    %1 = vector.load %arg1[%c0_1, %c0_2] : memref<3x32xf32, #tpu.memory_space<vmem>>, vector<3x32xf32>
    %c0_3 = arith.constant 0 : index
    %c0_4 = arith.constant 0 : index
    %2 = vector.load %arg2[%c0_3, %c0_4] : memref<33x69xf32, #tpu.memory_space<vmem>>, vector<32x69xf32>
    %c32 = arith.constant 32 : index
    %c0_5 = arith.constant 0 : index
    %3 = vector.load %arg2[%c32, %c0_5] : memref<33x69xf32, #tpu.memory_space<vmem>>, vector<1x69xf32>
    %4 = tpu.transpose %0, [1, 0] : vector<3x3xf32> -> vector<3x3xf32>
    %5 = vector.extract_strided_slice %4 {offsets = [0, 0], sizes = [1, 3], strides = [1, 1]} : vector<3x3xf32> to vector<1x3xf32>
    %6 = vector.extract_strided_slice %0 {offsets = [0, 0], sizes = [3, 1], strides = [1, 1]} : vector<3x3xf32> to vector<3x1xf32>
    %7 = vector.broadcast %5 : vector<1x3xf32> to vector<3x3xf32>
    %8 = vector.broadcast %6 : vector<3x1xf32> to vector<3x3xf32>
    %9 = arith.subf %7, %8 : vector<3x3xf32>
    %10 = vector.extract_strided_slice %4 {offsets = [1, 0], sizes = [1, 3], strides = [1, 1]} : vector<3x3xf32> to vector<1x3xf32>
    %11 = vector.extract_strided_slice %0 {offsets = [0, 1], sizes = [3, 1], strides = [1, 1]} : vector<3x3xf32> to vector<3x1xf32>
    %12 = vector.broadcast %10 : vector<1x3xf32> to vector<3x3xf32>
    %13 = vector.broadcast %11 : vector<3x1xf32> to vector<3x3xf32>
    %14 = arith.subf %12, %13 : vector<3x3xf32>
    %15 = vector.extract_strided_slice %4 {offsets = [2, 0], sizes = [1, 3], strides = [1, 1]} : vector<3x3xf32> to vector<1x3xf32>
    %16 = vector.extract_strided_slice %0 {offsets = [0, 2], sizes = [3, 1], strides = [1, 1]} : vector<3x3xf32> to vector<3x1xf32>
    %17 = vector.broadcast %15 : vector<1x3xf32> to vector<3x3xf32>
    %18 = vector.broadcast %16 : vector<3x1xf32> to vector<3x3xf32>
    %19 = arith.subf %17, %18 : vector<3x3xf32>
    %20 = arith.mulf %9, %9 : vector<3x3xf32>
    %21 = arith.mulf %14, %14 : vector<3x3xf32>
    %22 = arith.addf %20, %21 : vector<3x3xf32>
    %23 = arith.mulf %19, %19 : vector<3x3xf32>
    %24 = arith.addf %22, %23 : vector<3x3xf32>
    %25 = math.sqrt %24 : vector<3x3xf32>
    %cst = arith.constant 0.000000e+00 : f32
    %26 = vector.broadcast %cst : f32 to vector<3x3xf32>
    %27 = arith.subf %26, %25 : vector<3x3xf32>
    %28 = math.exp %27 : vector<3x3xf32>
    %cst_6 = arith.constant 9.99999997E-7 : f32
    %29 = vector.broadcast %cst_6 : f32 to vector<3x3xf32>
    %30 = arith.addf %25, %29 : vector<3x3xf32>
    %cst_7 = arith.constant 1.000000e+00 : f32
    %31 = vector.broadcast %cst_7 : f32 to vector<3x3xf32>
    %32 = arith.divf %31, %30 : vector<3x3xf32>
    %cst_8 = arith.constant dense<0.000000e+00> : vector<3x69xf32>
    %33 = tpu.matmul %1, %2, %cst_8 {dimension_numbers = #tpu.dot_dimension_numbers<[1], [0], [0], [1], [0, 0, 1, 1], [], []>} : vector<3x32xf32>, vector<32x69xf32>, vector<3x69xf32> -> vector<3x69xf32>
    %34 = vector.broadcast %3 : vector<1x69xf32> to vector<3x69xf32>
    %35 = arith.addf %33, %34 : vector<3x69xf32>
    %36 = vector.extract_strided_slice %35 {offsets = [0, 64], sizes = [3, 4], strides = [1, 1]} : vector<3x69xf32> to vector<3x4xf32>
    %37 = tpu.transpose %36, [1, 0] : vector<3x4xf32> -> vector<4x3xf32>
    %38 = vector.extract_strided_slice %3 {offsets = [0, 68], sizes = [1, 1], strides = [1, 1]} : vector<1x69xf32> to vector<1x1xf32>
    %39 = vector.extract_strided_slice %35 {offsets = [0, 0], sizes = [3, 8], strides = [1, 1]} : vector<3x69xf32> to vector<3x8xf32>
    %40 = vector.extract_strided_slice %35 {offsets = [0, 32], sizes = [3, 8], strides = [1, 1]} : vector<3x69xf32> to vector<3x8xf32>
    %cst_9 = arith.constant dense<0.000000e+00> : vector<3x3xf32>
    %41 = tpu.matmul %39, %40, %cst_9 {dimension_numbers = #tpu.dot_dimension_numbers<[1], [1], [0], [0], [0, 0, 1, 0], [], []>} : vector<3x8xf32>, vector<3x8xf32>, vector<3x3xf32> -> vector<3x3xf32>
    %cst_10 = arith.constant 0.353553385 : f32
    %42 = vector.broadcast %cst_10 : f32 to vector<3x3xf32>
    %43 = arith.mulf %41, %42 : vector<3x3xf32>
    %44 = arith.addf %43, %28 : vector<3x3xf32>
    %45 = vector.extract_strided_slice %35 {offsets = [0, 8], sizes = [3, 8], strides = [1, 1]} : vector<3x69xf32> to vector<3x8xf32>
    %46 = vector.extract_strided_slice %35 {offsets = [0, 40], sizes = [3, 8], strides = [1, 1]} : vector<3x69xf32> to vector<3x8xf32>
    %cst_11 = arith.constant dense<0.000000e+00> : vector<3x3xf32>
    %47 = tpu.matmul %45, %46, %cst_11 {dimension_numbers = #tpu.dot_dimension_numbers<[1], [1], [0], [0], [0, 0, 1, 0], [], []>} : vector<3x8xf32>, vector<3x8xf32>, vector<3x3xf32> -> vector<3x3xf32>
    %cst_12 = arith.constant 0.353553385 : f32
    %48 = vector.broadcast %cst_12 : f32 to vector<3x3xf32>
    %49 = arith.mulf %47, %48 : vector<3x3xf32>
    %50 = arith.addf %49, %28 : vector<3x3xf32>
    %51 = vector.extract_strided_slice %35 {offsets = [0, 16], sizes = [3, 8], strides = [1, 1]} : vector<3x69xf32> to vector<3x8xf32>
    %52 = vector.extract_strided_slice %35 {offsets = [0, 48], sizes = [3, 8], strides = [1, 1]} : vector<3x69xf32> to vector<3x8xf32>
    %cst_13 = arith.constant dense<0.000000e+00> : vector<3x3xf32>
    %53 = tpu.matmul %51, %52, %cst_13 {dimension_numbers = #tpu.dot_dimension_numbers<[1], [1], [0], [0], [0, 0, 1, 0], [], []>} : vector<3x8xf32>, vector<3x8xf32>, vector<3x3xf32> -> vector<3x3xf32>
    %cst_14 = arith.constant 0.353553385 : f32
    %54 = vector.broadcast %cst_14 : f32 to vector<3x3xf32>
    %55 = arith.mulf %53, %54 : vector<3x3xf32>
    %56 = arith.addf %55, %28 : vector<3x3xf32>
    %57 = vector.extract_strided_slice %35 {offsets = [0, 24], sizes = [3, 8], strides = [1, 1]} : vector<3x69xf32> to vector<3x8xf32>
    %58 = vector.extract_strided_slice %35 {offsets = [0, 56], sizes = [3, 8], strides = [1, 1]} : vector<3x69xf32> to vector<3x8xf32>
    %cst_15 = arith.constant dense<0.000000e+00> : vector<3x3xf32>
    %59 = tpu.matmul %57, %58, %cst_15 {dimension_numbers = #tpu.dot_dimension_numbers<[1], [1], [0], [0], [0, 0, 1, 0], [], []>} : vector<3x8xf32>, vector<3x8xf32>, vector<3x3xf32> -> vector<3x3xf32>
    %cst_16 = arith.constant 0.353553385 : f32
    %60 = vector.broadcast %cst_16 : f32 to vector<3x3xf32>
    %61 = arith.mulf %59, %60 : vector<3x3xf32>
    %62 = arith.addf %61, %28 : vector<3x3xf32>
    %cst_17 = arith.constant 0.000000e+00 : f32
    %63 = vector.broadcast %cst_17 : f32 to vector<3x3xf32>
    %cst_18 = arith.constant dense<0xFF800000> : vector<3xf32>
    %64 = vector.multi_reduction <maximumf>, %44, %cst_18 [1] : vector<3x3xf32> to vector<3xf32>
    %65 = vector.shape_cast %64 : vector<3xf32> to vector<3x1xf32>
    %66 = vector.broadcast %65 : vector<3x1xf32> to vector<3x3xf32>
    %67 = arith.subf %44, %66 : vector<3x3xf32>
    %68 = math.exp %67 : vector<3x3xf32>
    %cst_19 = arith.constant dense<0.000000e+00> : vector<3xf32>
    %69 = vector.multi_reduction <add>, %68, %cst_19 [1] : vector<3x3xf32> to vector<3xf32>
    %70 = vector.shape_cast %69 : vector<3xf32> to vector<3x1xf32>
    %71 = vector.broadcast %70 : vector<3x1xf32> to vector<3x3xf32>
    %72 = arith.divf %68, %71 : vector<3x3xf32>
    %73 = vector.extract_strided_slice %37 {offsets = [0, 0], sizes = [1, 3], strides = [1, 1]} : vector<4x3xf32> to vector<1x3xf32>
    %74 = vector.broadcast %73 : vector<1x3xf32> to vector<3x3xf32>
    %75 = arith.mulf %72, %74 : vector<3x3xf32>
    %76 = arith.addf %63, %75 : vector<3x3xf32>
    %cst_20 = arith.constant dense<0xFF800000> : vector<3xf32>
    %77 = vector.multi_reduction <maximumf>, %50, %cst_20 [1] : vector<3x3xf32> to vector<3xf32>
    %78 = vector.shape_cast %77 : vector<3xf32> to vector<3x1xf32>
    %79 = vector.broadcast %78 : vector<3x1xf32> to vector<3x3xf32>
    %80 = arith.subf %50, %79 : vector<3x3xf32>
    %81 = math.exp %80 : vector<3x3xf32>
    %cst_21 = arith.constant dense<0.000000e+00> : vector<3xf32>
    %82 = vector.multi_reduction <add>, %81, %cst_21 [1] : vector<3x3xf32> to vector<3xf32>
    %83 = vector.shape_cast %82 : vector<3xf32> to vector<3x1xf32>
    %84 = vector.broadcast %83 : vector<3x1xf32> to vector<3x3xf32>
    %85 = arith.divf %81, %84 : vector<3x3xf32>
    %86 = vector.extract_strided_slice %37 {offsets = [1, 0], sizes = [1, 3], strides = [1, 1]} : vector<4x3xf32> to vector<1x3xf32>
    %87 = vector.broadcast %86 : vector<1x3xf32> to vector<3x3xf32>
    %88 = arith.mulf %85, %87 : vector<3x3xf32>
    %89 = arith.addf %76, %88 : vector<3x3xf32>
    %cst_22 = arith.constant dense<0xFF800000> : vector<3xf32>
    %90 = vector.multi_reduction <maximumf>, %56, %cst_22 [1] : vector<3x3xf32> to vector<3xf32>
    %91 = vector.shape_cast %90 : vector<3xf32> to vector<3x1xf32>
    %92 = vector.broadcast %91 : vector<3x1xf32> to vector<3x3xf32>
    %93 = arith.subf %56, %92 : vector<3x3xf32>
    %94 = math.exp %93 : vector<3x3xf32>
    %cst_23 = arith.constant dense<0.000000e+00> : vector<3xf32>
    %95 = vector.multi_reduction <add>, %94, %cst_23 [1] : vector<3x3xf32> to vector<3xf32>
    %96 = vector.shape_cast %95 : vector<3xf32> to vector<3x1xf32>
    %97 = vector.broadcast %96 : vector<3x1xf32> to vector<3x3xf32>
    %98 = arith.divf %94, %97 : vector<3x3xf32>
    %99 = vector.extract_strided_slice %37 {offsets = [2, 0], sizes = [1, 3], strides = [1, 1]} : vector<4x3xf32> to vector<1x3xf32>
    %100 = vector.broadcast %99 : vector<1x3xf32> to vector<3x3xf32>
    %101 = arith.mulf %98, %100 : vector<3x3xf32>
    %102 = arith.addf %89, %101 : vector<3x3xf32>
    %cst_24 = arith.constant dense<0xFF800000> : vector<3xf32>
    %103 = vector.multi_reduction <maximumf>, %62, %cst_24 [1] : vector<3x3xf32> to vector<3xf32>
    %104 = vector.shape_cast %103 : vector<3xf32> to vector<3x1xf32>
    %105 = vector.broadcast %104 : vector<3x1xf32> to vector<3x3xf32>
    %106 = arith.subf %62, %105 : vector<3x3xf32>
    %107 = math.exp %106 : vector<3x3xf32>
    %cst_25 = arith.constant dense<0.000000e+00> : vector<3xf32>
    %108 = vector.multi_reduction <add>, %107, %cst_25 [1] : vector<3x3xf32> to vector<3xf32>
    %109 = vector.shape_cast %108 : vector<3xf32> to vector<3x1xf32>
    %110 = vector.broadcast %109 : vector<3x1xf32> to vector<3x3xf32>
    %111 = arith.divf %107, %110 : vector<3x3xf32>
    %112 = vector.extract_strided_slice %37 {offsets = [3, 0], sizes = [1, 3], strides = [1, 1]} : vector<4x3xf32> to vector<1x3xf32>
    %113 = vector.broadcast %112 : vector<1x3xf32> to vector<3x3xf32>
    %114 = arith.mulf %111, %113 : vector<3x3xf32>
    %115 = arith.addf %102, %114 : vector<3x3xf32>
    %116 = arith.mulf %115, %32 : vector<3x3xf32>
    %117 = arith.mulf %0, %116 : vector<3x3xf32>
    %cst_26 = arith.constant dense<0.000000e+00> : vector<3xf32>
    %118 = vector.multi_reduction <add>, %117, %cst_26 [1] : vector<3x3xf32> to vector<3xf32>
    %119 = vector.shape_cast %118 : vector<3xf32> to vector<3x1xf32>
    %cst_27 = arith.constant dense<0.000000e+00> : vector<3x3xf32>
    %120 = tpu.matmul %116, %0, %cst_27 {dimension_numbers = #tpu.dot_dimension_numbers<[1], [1], [0], [0], [0, 0, 1, 0], [], []>} : vector<3x3xf32>, vector<3x3xf32>, vector<3x3xf32> -> vector<3x3xf32>
    %121 = vector.broadcast %119 : vector<3x1xf32> to vector<3x3xf32>
    %122 = arith.subf %121, %120 : vector<3x3xf32>
    %123 = vector.broadcast %38 : vector<1x1xf32> to vector<3x3xf32>
    %124 = arith.addf %122, %123 : vector<3x3xf32>
    %c0_28 = arith.constant 0 : index
    %c0_29 = arith.constant 0 : index
    %125 = vector.load %arg3[%c0_28, %c0_29] : memref<3x3xf32, #tpu.memory_space<vmem>>, vector<3x3xf32>
    tpu.vector_store %arg3[%c0_28, %c0_29], %124 {strides = array<i32>} : memref<3x3xf32, #tpu.memory_space<vmem>>, vector<3x3xf32>,
    return
  }
}

</mosaic_0001>

<bundles_post_ra>
// kernel: tpu_custom_call.1
= control target key start
LH: loop header
LB: loop body
LE: loop exit
PB: predicated region body
PF: predicated region fallthrough
CT: control target
= control target key end

     0   :  { %8 = vsyncpa [#allocation3], 0  ;;  %s1128_s0 = inlined_call_operand.hbm [shape: f32[3,3], index: 0, kind: input, shape index: {}]   ;;  %s1129_s1 = inlined_call_operand.hbm [shape: f32[3,32], index: 1, kind: input, shape index: {}]   ;;  %s1130_s2 = inlined_call_operand.hbm [shape: f32[33,69], index: 2, kind: input, shape index: {}]   ;;  %s1131_s3 = inlined_call_operand.hbm [shape: f32[3,3], index: 3, kind: output, shape index: {}]  }
   0x1   :  { %9 = vsyncpa [#allocation6], 0 }
   0x2   :  { %10 = vsyncpa [#allocation4], 0  ;;  %s956_s12 = smov [#allocation5]   ;;  %s957_s14 = smov [#allocation2]  }
   0x3   :  { %s27_s13 = sshll.u32 %s956_s12, 4  ;;  %s17_s15 = sshll.u32 %s957_s14, 4  ;;  %s28_s13 = int_to_ptr.vmem [resolvable:$true] %s27_s13  ;;  %s18_s15 = int_to_ptr.vmem [resolvable:$true] %s17_s15 }
   0x4   :  { %s862_s18 = scalar_lea.hbm %s1129_s1, 64 }
   0x5   :  { %p863_p0 = scmp.ne.s32.totalorder %s1129_s1, %s862_s18  ;;  %p866_p1 = scmp.lt.u32.totalorder %s862_s18, %s1129_s1 }
   0x7   :  { %p868_p2 = pnand %p866_p1, %p863_p0 }
   0x9   :  { %871 = shalt.err (!%p868_p2)
}
   0xa   :  { %s872_s23 = scalar_lea.vmem %s28_s13, 64  ;;  %p877_p4 = scmp.lt.s32.totalorder %s28_s13, %s28_s13 }
   0xb   :  { %p873_p3 = scmp.ne.s32.totalorder %s28_s13, %s872_s23  ;;  %p878_p5 = scmp.lt.s32.totalorder %s872_s23, %s872_s23 }
   0xd   :  { %p879_p6 = por %p878_p5, %p877_p4 }
   0xf   :  { %p880_p7 = pnand %p879_p6, %p873_p3 }
  0x11   :  { %883 = shalt.err (!%p880_p7)
}
  0x12   :  { %30 = dma.hbm_to_vmem [thread:$0]  %s1129_s1, 64, %s28_s13, [#allocation6]  }
  0x13   :  { %s884_s28 = scalar_lea.hbm %s1128_s0, 64 }
  0x14   :  { %p885_p8 = scmp.ne.s32.totalorder %s1128_s0, %s884_s28  ;;  %p888_p9 = scmp.lt.u32.totalorder %s884_s28, %s1128_s0 }
  0x16   :  { %p890_p10 = pnand %p888_p9, %p885_p8 }
  0x18   :  { %893 = shalt.err (!%p890_p10)
}
  0x19   :  { %s894_s6 = scalar_lea.vmem %s18_s15, 64  ;;  %p899_p12 = scmp.lt.s32.totalorder %s18_s15, %s18_s15 }
  0x1a   :  { %p895_p11 = scmp.ne.s32.totalorder %s18_s15, %s894_s6  ;;  %p900_p13 = scmp.lt.s32.totalorder %s894_s6, %s894_s6 }
  0x1c   :  { %p901_p0 = por %p900_p13, %p899_p12 }
  0x1e   :  { %p902_p1 = pnand %p901_p0, %p895_p11 }
  0x20   :  { %905 = shalt.err (!%p902_p1)
}
  0x21   :  { %20 = dma.hbm_to_vmem [thread:$0]  %s1128_s0, 64, %s18_s15, [#allocation3]  }
  0x22   :  { %s958_s8 = smov [#allocation7]   ;;  %s906_s12 = scalar_lea.hbm %s1130_s2, 640 }
  0x23   :  { %s36_s9 = sshll.u32 %s958_s8, 4  ;;  %p907_p2 = scmp.ne.s32.totalorder %s1130_s2, %s906_s12  ;;  %s37_s9 = int_to_ptr.vmem [resolvable:$true] %s36_s9 }
  0x24   :  { %p910_p3 = scmp.lt.u32.totalorder %s906_s12, %s1130_s2 }
  0x26   :  { %p912_p4 = pnand %p910_p3, %p907_p2 }
  0x28   :  { %915 = shalt.err (!%p912_p4)
}
  0x29   :  { %s916_s18 = scalar_lea.vmem %s37_s9, 640  ;;  %p921_p6 = scmp.lt.s32.totalorder %s37_s9, %s37_s9 }
  0x2a   :  { %p917_p5 = scmp.ne.s32.totalorder %s37_s9, %s916_s18  ;;  %p922_p7 = scmp.lt.s32.totalorder %s916_s18, %s916_s18 }
  0x2c   :  { %p923_p8 = por %p922_p7, %p921_p6 }
  0x2e   :  { %p924_p9 = pnand %p923_p8, %p917_p5 }
  0x30   :  { %927 = shalt.err (!%p924_p9)
}
  0x31   :  { %s959_s0 = smov 128   ;;  %s960_s15 = smov 8  }
  0x32   :  { %42 = dma.hbm_to_vmem [thread:$0]  %s1130_s2, 640, %s37_s9, [#allocation6], %s959_s0, %s959_s0, %s960_s15  }
  0x33   :  { %950 = dma.done.wait [#allocation3], 64  }
  0x34   :  { %951 = vsyncadd [#allocation3], 4294967232 }
  0x35   :  { %952 = dma.done.wait [#allocation6], 704  }
  0x36   :  { %953 = vsyncadd [#allocation6], 4294966592  ;;  %v961_v0 = vmov 0.0|0.0   ;;  %vm962_vm0 = vmmov 0   ;;  %v963_v1 = vmov 0.0   ;;  %v54_v2 = vld [vmem:[#allocation7] sm:$0xff]  ;;  %v91_v11 = vlaneseq }
  0x37   :  { %807 = vmatprep.subr.bf16.mxu0 %v961_v0  ;;  %779 = vmatprep.mubr.msk.f32.mxu0 %vm962_vm0, %v963_v1  ;;  %v55_v3 = vld [vmem:[#allocation7 + $0x8] sm:$0xff]  ;;  %v56_v4 = vld [vmem:[#allocation7 + $0x10] sm:$0xff]  ;;  %v57_v6 = vld [vmem:[#allocation7 + $0x18] sm:$0xff]  ;;  %vm141_vm1 = vcmask 261120   ;;  %v964_v9 = vmov 0   ;;  %v965_v10 = vmov 1  }
  0x38   :  { %782 = vmatprep.subr.mxu1 %v963_v1  ;;  %784 = vmatprep.mubr.msk.f32.mxu1 %vm962_vm0, %v963_v1  ;;  %v808_v5 = vpack.c.bf16 %v55_v3, %v54_v2  ;;  %v811_v7 = vpack.c.bf16 %v57_v6, %v56_v4  ;;  %v53_v8 = vld [vmem:[#allocation5] sm:$0x7]  ;;  %v1041_v12 = vshrl.u32 %v91_v11, 7  ;;  %v1046_v14 = vld [vmem:[#allocation7 + $0x20] sm:$0x1]  ;;  %s966_s2 = smov 80  }
  0x39   :  { %836 = vset.pattern.permute.xlu1 %v964_v9  ;;  %837 = vset.pattern.permute.xlu0 %v965_v10  ;;  %s967_s21 = smov 96   ;;  %s968_s22 = smov 120   ;;  %v1058_v19 = vld [vmem:[#allocation2] sm:$0x7]  ;;  %v973_v20 = vmov 2   ;;  %vm253_vm2 = vcmask 64512  }
  0x3a   :  { %809 = vmatpush3.bf16.msra.mxu0 %v808_v5  ;;  %v1044_v13 = vsub.s32 0, %v1041_v12  ;;  %s969_s23 = smov 88   ;;  %s970_s24 = smov 112   ;;  %v103_v30 = vsub.s32 1, %v1041_v12  ;;  %v112_v32 = vsub.s32 2, %v1041_v12  ;;  %vm570_vm5 = vcmask 18432  }
  0x3b   :  { %810 = vmatprep.subr.bf16.mxu0 %v961_v0  ;;  %s971_s25 = smov 72   ;;  %s972_s26 = smov 104   ;;  %vm644_vm6 = vcmask 23552  }
  0x3c   :  { %v140_v15 = vrot.slane %v1046_v14, %v1044_v13  ;;  %s974_s27 = smov 64   ;;  %s975_s28 = smov 60  }
  0x3d   :  { %s976_s30 = smov [#allocation8]  }
  0x3e   :  { %812 = vmatpush3.bf16.msra.mxu0 %v811_v7  ;;  %s735_s4 = sshll.u32 %s976_s30, 4  ;;  %s736_s4 = int_to_ptr.vmem [resolvable:$true] %s735_s4 }
  0x3f   :  { %792 = vmatprep.subr.mxu0 %v963_v1  ;;  %s928_s5 = scalar_lea.vmem %s736_s4, 64  ;;  %p933_p11 = scmp.lt.s32.totalorder %s736_s4, %s736_s4 }
  0x40   :  { %p929_p10 = scmp.ne.s32.totalorder %s736_s4, %s928_s5  ;;  %p934_p12 = scmp.lt.s32.totalorder %s928_s5, %s928_s5 }
  0x41   :  { %780 = vmatmul.mubr.msk.f32.vlgmr.msra.gmra.mrb[0].mxu0 %vm141_vm1, %v53_v8 }
  0x42   :  { %794 = vmatprep.mubr.msk.f32.mxu0 %vm962_vm0, %v963_v1  ;;  %p935_p13 = por %p934_p12, %p933_p11 }
  0x44   :  { %p936_p0 = pnand %p935_p13, %p929_p10 }
 0x114   :  { %v211_v16 = vpop.f32.mrb[0].mxu0 }
 0x115   :  { %v1050_v17 = vadd.f32 %v211_v16, %v140_v15  ;;  %v781_v18 = vpop.f32.mrb[1].mxu0 }
 0x117   :  { %412 = vrot.lane.b32.xlu1 %v1050_v17, %s966_s2  ;;  %251 = vrot.lane.b32.xlu0 %v1050_v17, %s967_s21 }
 0x11b   :  { %330 = vrot.lane.b32.xlu1 %v1050_v17, %s968_s22  ;;  %332 = vrot.lane.b32.xlu0 %v1050_v17, %s969_s23 }
 0x11f   :  { %410 = vrot.lane.b32.xlu1 %v1050_v17, %s970_s24  ;;  %492 = vrot.lane.b32.xlu0 %v1050_v17, %s971_s25 }
 0x123   :  { %490 = vrot.lane.b32.xlu0 %v1050_v17, %s972_s26  ;;  %97 = vperm.xlu1 %836, %v1058_v19  }
 0x127   :  { %838 = vset.pattern.permute.xlu1 %v973_v20  ;;  %106 = vperm.xlu0 %837, %v1058_v19  }
 0x128   :  { %115 = vperm.xlu1 %838, %v1058_v19  }
 0x12b   :  { %839 = vset.pattern.permute.xlu0 %v973_v20 }
 0x151   :  { %59 = vxpose.xlu1.b32.start.end [1/1] (short) (narrow) %v1058_v19, 8 }
 0x189   :  { %v413_v21 = vpop.permute.xlu1 %412  ;;  %v252_v22 = vpop.permute.xlu0 %251 }
 0x18a   :  { %783 = vmatpush3.xpose.msk.msra.mxu1 %vm253_vm2, %v252_v22  ;;  %793 = vmatpush3.xpose.msk.msra.mxu0 %vm253_vm2, %v413_v21 }
 0x18b   :  { %787 = vmatprep.subr.mxu1 %v963_v1  ;;  %802 = vmatprep.subr.mxu0 %v963_v1 }
 0x18d   :  { %v331_v23 = vpop.permute.xlu1 %330  ;;  %785 = vmatmul.mubr.msk.f32.vlgmr.msra.gmra.mrb[0].mxu1 %vm253_vm2, %v1050_v17  ;;  %v333_v24 = vpop.permute.xlu0 %332 }
 0x18e   :  { %788 = vmatpush3.xpose.msk.msra.mxu1 %vm253_vm2, %v333_v24  ;;  %789 = vmatprep.mubr.msk.f32.mxu1 %vm962_vm0, %v963_v1 }
 0x18f   :  { %797 = vmatprep.subr.mxu1 %v963_v1 }
 0x191   :  { %v411_v25 = vpop.permute.xlu1 %410  ;;  %790 = vmatmul.mubr.msk.f32.vlgmr.msra.gmra.mrb[2].mxu1 %vm253_vm2, %v331_v23  ;;  %v493_v26 = vpop.permute.xlu0 %492 }
 0x192   :  { %795 = vmatmul.mubr.msk.f32.vlgmr.msra.gmra.mrb[2].mxu0 %vm253_vm2, %v411_v25  ;;  %798 = vmatpush3.xpose.msk.msra.mxu1 %vm253_vm2, %v493_v26 }
 0x193   :  { %799 = vmatprep.mubr.msk.f32.mxu1 %vm962_vm0, %v963_v1  ;;  %804 = vmatprep.mubr.msk.f32.mxu0 %vm962_vm0, %v963_v1 }
 0x194   :  { %803 = vmatpush3.xpose.msk.msra.mxu0 %vm644_vm6, %v1058_v19 }
 0x195   :  { %v491_v27 = vpop.permute.xlu0 %490 }
 0x196   :  { %800 = vmatmul.mubr.msk.f32.vlgmr.msra.gmra.mrb[4].mxu1 %vm253_vm2, %v491_v27 }
 0x1a2   :  { %v98_v28 = vpop.permute.xlu1 %97 }
 0x1a6   :  { %v107_v35 = vpop.permute.xlu0 %106 }
 0x1a7   :  { %v116_v29 = vpop.permute.xlu1 %115 }
 0x1d1   :  { %v75_v31 = vpop.trf.xlu1 }
 0x1d2   :  { %v94_v33 = vrot.slane %v75_v31, %v1044_v13  ;;  %v104_v34 = vrot.slane %v75_v31, %v103_v30  ;;  %v113_v36 = vrot.slane %v75_v31, %v112_v32 }
 0x1d4   :  { %v100_v37 = vsub.f32 %v94_v33, %v98_v28  ;;  %v109_v38 = vsub.f32 %v104_v34, %v107_v35  ;;  %v118_v39 = vsub.f32 %v113_v36, %v116_v29 }
 0x1d6   :  { %v119_v40 = vmul.f32 %v100_v37, %v100_v37  ;;  %v120_v41 = vmul.f32 %v109_v38, %v109_v38  ;;  %v122_v42 = vmul.f32 %v118_v39, %v118_v39 }
 0x1d8   :  { %v121_v43 = vadd.f32 %v120_v41, %v119_v40 }
 0x1da   :  { %v123_v44 = vadd.f32 %v122_v42, %v121_v43  ;;  %v635_v43 = vsub.s32 3, %v1041_v12 }
 0x1dc   :  { %840 = vrsqrt.f32 %v123_v44  ;;  %vm126_vm3 = vcmp.eq.f32.partialorder %v123_v44, inf  ;;  %v129_v47 = vand.u32 2147483648, %v123_v44  ;;  %vm128_vm4 = vcmp.eq.f32.partialorder %v123_v44, 0.0 }
 0x1e6   :  { %v841_v45 = vpop.eup %840 }
 0x1e7   :  { %v125_v46 = vmul.f32 %v841_v45, %v123_v44 }
 0x1e9   :  { %v127_v48 = vsel %vm126_vm3, %v123_v44, %v125_v46 }
 0x1ea   :  { %v1090_v49 = vsel %vm128_vm4, %v129_v47, %v127_v48 }
 0x1eb   :  { %v131_v50 = vsub.f32 0.0, %v1090_v49  ;;  %v134_v41 = vadd.f32 1e-06, %v1090_v49 }
 0x1ed   :  { %v132_v51 = vmul.f32 1.442695, %v131_v50 }
 0x1ef   :  { %842 = vpow2.f32 %v132_v51 }
 0x1f9   :  { %v843_v55 = vpop.eup %842 }
 0x260   :  { %v324_v52 = vpop.f32.mrb[0].mxu1 }
 0x261   :  { %v328_v53 = vmul.f32 0.35355338, %v324_v52  ;;  %v786_v54 = vpop.f32.mrb[1].mxu1 }
 0x263   :  { %v329_v56 = vadd.f32 %v843_v55, %v328_v53 }
 0x264   :  { %v404_v57 = vpop.f32.mrb[2].mxu1 }
 0x265   :  { %v408_v58 = vmul.f32 0.35355338, %v404_v57  ;;  %v791_v59 = vpop.f32.mrb[3].mxu1  ;;  %v484_v60 = vpop.f32.mrb[2].mxu0  ;;  %v571_v61 = vsel %vm570_vm5, %v329_v56, -inf }
 0x266   :  { %v488_v62 = vmul.f32 0.35355338, %v484_v60  ;;  %v796_v63 = vpop.f32.mrb[3].mxu0  ;;  %572 = vmax.xlane.f32.xlu0 %v571_v61 }
 0x267   :  { %v409_v0 = vadd.f32 %v843_v55, %v408_v58 }
 0x268   :  { %v489_v3 = vadd.f32 %v843_v55, %v488_v62 }
 0x269   :  { %v564_v1 = vpop.f32.mrb[4].mxu1  ;;  %v588_v2 = vsel %vm570_vm5, %v409_v0, -inf }
 0x26a   :  { %v568_v4 = vmul.f32 0.35355338, %v564_v1  ;;  %v801_v5 = vpop.f32.mrb[5].mxu1  ;;  %589 = vmax.xlane.f32.xlu0 %v588_v2  ;;  %v605_v7 = vsel %vm570_vm5, %v489_v3, -inf }
 0x26c   :  { %v569_v6 = vadd.f32 %v843_v55, %v568_v4 }
 0x26e   :  { %606 = vmax.xlane.f32.xlu0 %v605_v7  ;;  %v622_v8 = vsel %vm570_vm5, %v569_v6, -inf }
 0x26f   :  { %623 = vmax.xlane.f32.xlu1 %v622_v8 }
 0x284   :  { %216 = vrot.lane.b32.xlu0 %v1050_v17, %s974_s27 }
 0x2f3   :  { %v573_v9 = vpop.xlane.xlu0 %572 }
 0x2f4   :  { %v574_v10 = vsub.f32 %v329_v56, %v573_v9 }
 0x2f6   :  { %v575_v11 = vmul.f32 1.442695, %v574_v10 }
 0x2f7   :  { %v590_v15 = vpop.xlane.xlu0 %589 }
 0x2f8   :  { %844 = vpow2.f32 %v575_v11  ;;  %v591_v16 = vsub.f32 %v409_v0, %v590_v15 }
 0x2fa   :  { %v592_v22 = vmul.f32 1.442695, %v591_v16 }
 0x2fb   :  { %v607_v18 = vpop.xlane.xlu0 %606 }
 0x2fc   :  { %v608_v20 = vsub.f32 %v489_v3, %v607_v18  ;;  %v624_v21 = vpop.xlane.xlu1 %623 }
 0x2fd   :  { %v625_v24 = vsub.f32 %v569_v6, %v624_v21 }
 0x2fe   :  { %v609_v23 = vmul.f32 1.442695, %v608_v20 }
 0x2ff   :  { %v626_v26 = vmul.f32 1.442695, %v625_v24  ;;  %v217_v35 = vpop.permute.xlu0 %216 }
 0x300   :  { %846 = vpow2.f32 %v609_v23 }
 0x301   :  { %848 = vpow2.f32 %v592_v22 }
 0x302   :  { %v845_v25 = vpop.eup %844  ;;  %850 = vpow2.f32 %v626_v26 }
 0x303   :  { %v577_v27 = vsel %vm570_vm5, %v845_v25, 0.0 }
 0x304   :  { %578 = vadd.xlane.f32.xlu0 %v577_v27 }
 0x30a   :  { %v847_v17 = vpop.eup %846 }
 0x30b   :  { %v611_v28 = vsel %vm570_vm5, %v847_v17, 0.0  ;;  %v849_v29 = vpop.eup %848 }
 0x30c   :  { %612 = vadd.xlane.f32.xlu1 %v611_v28  ;;  %v594_v31 = vsel %vm570_vm5, %v849_v29, 0.0  ;;  %v851_v33 = vpop.eup %850 }
 0x30d   :  { %v628_v34 = vsel %vm570_vm5, %v851_v33, 0.0 }
 0x310   :  { %595 = vadd.xlane.f32.xlu1 %v594_v31 }
 0x314   :  { %629 = vadd.xlane.f32.xlu1 %v628_v34 }
 0x31a   :  { %722 = vrot.lane.b32.xlu0 %v1046_v14, %s975_s28 }
 0x347   :  { %219 = vxpose.xlu1.b32.start.end [1/1] (short) (narrow) %v217_v35, 8 }
 0x391   :  { %v579_v36 = vpop.xlane.xlu0 %578 }
 0x392   :  { %852 = vrcp.f32 %v579_v36 }
 0x395   :  { %v723_v37 = vpop.permute.xlu0 %722 }
 0x396   :  { %813 = vpush %v723_v37 }
 0x399   :  { %v613_v38 = vpop.xlane.xlu1 %612 }
 0x39c   :  { %v853_v42 = vpop.eup %852 }
 0x39d   :  { %v596_v39 = vpop.xlane.xlu1 %595  ;;  %v581_v46 = vmul.f32 %v853_v42, %v845_v25 }
 0x39e   :  { %854 = vrcp.f32 %v596_v39 }
 0x39f   :  { %856 = vrcp.f32 %v613_v38 }
 0x3a1   :  { %v630_v40 = vpop.xlane.xlu1 %629 }
 0x3a2   :  { %858 = vrcp.f32 %v630_v40 }
 0x3a3   :  { %860 = vrcp.f32 %v134_v41 }
 0x3a8   :  { %v855_v14 = vpop.eup %854 }
 0x3a9   :  { %v857_v44 = vpop.eup %856  ;;  %v598_v47 = vmul.f32 %v855_v14, %v849_v29 }
 0x3aa   :  { %v615_v53 = vmul.f32 %v857_v44, %v847_v17 }
 0x3ac   :  { %v859_v52 = vpop.eup %858 }
 0x3ad   :  { %v632_v56 = vmul.f32 %v859_v52, %v851_v33  ;;  %v861_v62 = vpop.eup %860 }
 0x3c7   :  { %v235_v45 = vpop.trf.xlu1  ;;  %s814_s29 = spop %813 }
 0x3c8   :  { %v585_v48 = vrot.slane %v235_v45, %v1044_v13  ;;  %v602_v50 = vrot.slane %v235_v45, %v103_v30  ;;  %v619_v51 = vrot.slane %v235_v45, %v112_v32  ;;  %v636_v55 = vrot.slane %v235_v45, %v635_v43 }
 0x3c9   :  { %v725_v2 = vstv %s814_s29 }
 0x3ca   :  { %v586_v49 = vmul.f32 %v585_v48, %v581_v46  ;;  %v603_v54 = vmul.f32 %v602_v50, %v598_v47  ;;  %v620_v58 = vmul.f32 %v619_v51, %v615_v53  ;;  %v637_v60 = vmul.f32 %v636_v55, %v632_v56 }
 0x3cc   :  { %v604_v57 = vadd.f32 %v603_v54, %v586_v49 }
 0x3ce   :  { %v621_v59 = vadd.f32 %v620_v58, %v604_v57 }
 0x3d0   :  { %v638_v61 = vadd.f32 %v637_v60, %v621_v59 }
 0x3d2   :  { %v639_v63 = vmul.f32 %v861_v62, %v638_v61 }
 0x3d4   :  { %805 = vmatmul.mubr.msk.f32.vlgmr.msra.gmra.mrb[4].mxu0 %vm644_vm6, %v639_v63  ;;  %v640_v13 = vmul.f32 %v639_v63, %v1058_v19 }
 0x3d6   :  { %v641_v12 = vsel %vm570_vm5, %v640_v13, 0.0 }
 0x3d7   :  { %642 = vadd.xlane.f32.xlu0 %v641_v12 }
 0x464   :  { %v643_v30 = vpop.xlane.xlu0 %642 }
 0x4a7   :  { %v716_v32 = vpop.f32.mrb[4].mxu0 }
 0x4a8   :  { %v720_v0 = vsub.f32 %v643_v30, %v716_v32  ;;  %v806_v1 = vpop.f32.mrb[5].mxu0 }
 0x4aa   :  { %v727_v3 = vadd.f32 %v725_v2, %v720_v0 }
 0x4ac   :  { %728 = vst.msk [vmem:[#allocation8] sm:$0x7] %vm570_vm5, %v727_v3 }
 0x4ad   :  { %939 = shalt.err (!%p936_p0)
}
 0x4ae   :  { %s940_s7 = scalar_lea.hbm %s1131_s3, 64 }
 0x4af   :  { %p941_p1 = scmp.ne.s32.totalorder %s1131_s3, %s940_s7  ;;  %p944_p2 = scmp.lt.u32.totalorder %s940_s7, %s1131_s3 }
 0x4b1   :  { %p946_p3 = pnand %p944_p2, %p941_p1 }
 0x4b3   :  { %949 = shalt.err (!%p946_p3)
}
 0x4b4   :  { %738 = dma.vmem_to_hbm [thread:$0]  %s736_s4, 64, %s1131_s3, [#allocation4]  }
 0x4b5   :  { %954 = dma.done.wait [#allocation4], 64  }
 0x4b6   :  { %955 = vsyncadd [#allocation4], 4294967232 }
 0x4b7   :  { %742 = vsyncpa [#allocation3], 1 }
 0x4b8   :  { %743 = vsyncpa [#allocation6], 1 }
 0x4b9   :  { %744 = vsyncpa [#allocation4], 1 }

</bundles_post_ra>
